<compile_context>
chip_gen: v7x
topology: tpu7x:2x2x1
jax: 0.10.0
libtpu: 0.0.40
codegen_flags: <defaults>
</compile_context>

<pallas_src>
import numpy as np
import jax
import jax.numpy as jnp
from jax.experimental import pallas as pl
from jax.experimental.pallas import tpu as pltpu


# ----------------------------------------------------------------------------
# Deterministic "parameter" construction (buffers of the module)
# ----------------------------------------------------------------------------
def hann_window_periodic(n):
    # torch.hann_window(n) default periodic=True
    return (0.5 - 0.5 * np.cos(2.0 * np.pi * np.arange(n) / n)).astype(np.float32)


def _hz_to_mel(freqs):
    freqs = np.asarray(freqs, dtype=np.float64)
    f_sp = 200.0 / 3.0
    mels = freqs / f_sp
    min_log_hz = 1000.0
    min_log_mel = min_log_hz / f_sp
    logstep = np.log(6.4) / 27.0
    return np.where(
        freqs >= min_log_hz,
        min_log_mel + np.log(np.maximum(freqs, min_log_hz) / min_log_hz) / logstep,
        mels,
    )


def _mel_to_hz(mels):
    mels = np.asarray(mels, dtype=np.float64)
    f_sp = 200.0 / 3.0
    freqs = f_sp * mels
    min_log_hz = 1000.0
    min_log_mel = min_log_hz / f_sp
    logstep = np.log(6.4) / 27.0
    return np.where(
        mels >= min_log_mel,
        min_log_hz * np.exp(logstep * (mels - min_log_mel)),
        freqs,
    )


def librosa_mel(sr, n_fft, n_mels, fmin, fmax):
    """Slaney-normalized mel filterbank, (n_mels, 1 + n_fft//2) like librosa.filters.mel."""
    n_bins = n_fft // 2 + 1
    fftfreqs = np.linspace(0.0, sr / 2.0, n_bins)
    mel_f = _mel_to_hz(np.linspace(_hz_to_mel(fmin), _hz_to_mel(fmax), n_mels + 2))
    fdiff = np.diff(mel_f)
    ramps = mel_f[:, None] - fftfreqs[None, :]
    lower = -ramps[:-2] / fdiff[:-1, None]
    upper = ramps[2:] / fdiff[1:, None]
    weights = np.maximum(0.0, np.minimum(lower, upper))
    enorm = 2.0 / (mel_f[2 : n_mels + 2] - mel_f[:n_mels])
    weights = weights * enorm[:, None]
    return weights.astype(np.float32)


def make_cheaptrick_tables(sr, fft_size, f0_floor, f0_ceil, q1=-0.15):
    """Precompute adaptive windows and lifters (buffers of CheapTrick)."""
    n_bin = fft_size // 2 + 1
    windows = np.zeros((f0_ceil + 1, fft_size), dtype=np.float32)
    smoothing = np.zeros((f0_ceil + 1, n_bin), dtype=np.float32)
    compensation = np.zeros((f0_ceil + 1, n_bin), dtype=np.float32)
    q0 = 1.0 - 2.0 * q1
    for f0 in range(f0_floor, f0_ceil + 1):
        half = int(round(1.5 * sr / f0))
        position = np.arange(-half, half + 1) / 1.5 / sr
        w = np.zeros(fft_size, dtype=np.float64)
        left = fft_size // 2 - half
        right = fft_size // 2 + half + 1
        w[left:right] = 0.5 * np.cos(np.pi * position * f0) + 0.5
        w = w / np.sqrt(np.sum(w * w))
        windows[f0] = w.astype(np.float32)

        quef = np.arange(1, n_bin) / sr
        sl = np.zeros(n_bin, dtype=np.float64)
        cl = np.zeros(n_bin, dtype=np.float64)
        sl[0] = 1.0
        sl[1:] = np.sin(np.pi * f0 * quef) / (np.pi * f0 * quef)
        cl[0] = q0 + 2.0 * q1
        cl[1:] = q0 + 2.0 * q1 * np.cos(2.0 * np.pi * f0 * quef)
        smoothing[f0] = sl.astype(np.float32)
        compensation[f0] = cl.astype(np.float32)
    return windows, smoothing, compensation


# ----------------------------------------------------------------------------
# JAX glue: STFT and CheapTrick (FFT-based spectral analysis)
# TODO(synk): rFFT/irFFT have no Pallas equivalent on TPU; the CheapTrick/STFT
#             analysis (the torch.no_grad() region of the original) stays in
#             plain JAX and is fused by XLA around the FFT calls.
# ----------------------------------------------------------------------------
def jax_stft(x, fft_size, hop_size, window, power=False):
    """torch.stft-style magnitude/power spectrogram, (B, T_frames, F_bins)."""
    pad = fft_size // 2
    xp = jnp.pad(x, ((0, 0), (pad, pad)), mode="reflect")
    n_frames = x.shape[1] // hop_size + 1
    idx = jnp.arange(n_frames)[:, None] * hop_size + jnp.arange(fft_size)[None, :]
    frames = xp[:, idx] * window[None, None, :]
    spec = jnp.fft.rfft(frames, n=fft_size, axis=-1)
    mag2 = spec.real**2 + spec.imag**2
    if power:
        return jnp.maximum(mag2, 1e-7)
    return jnp.sqrt(jnp.maximum(mag2, 1e-7))


def cheaptrick(x, f, tables, sr, fft_size, hop_size, f0_floor, f0_ceil,
               uv_threshold=0.0, power=False, elim_0th=True):
    """CheapTrick log spectral-envelope estimation, (B, T_frames, F_bins)."""
    windows_tbl, smooth_tbl, comp_tbl = tables
    n_bin = fft_size // 2 + 1

    # Step 0: unvoiced frames -> f0_ceil, round F0 to integer table index.
    f = jnp.where(f > uv_threshold, f, jnp.full_like(f, float(f0_ceil)))
    f_int = jnp.clip(jnp.round(f), f0_floor, f0_ceil).astype(jnp.int32)

    # Step 1: adaptive windowing + power spectrogram.
    pad = fft_size // 2
    xp = jnp.pad(x, ((0, 0), (pad, pad)))  # zero padding (ConstantPad)
    n_frames = x.shape[1] // hop_size + 1
    idx = jnp.arange(n_frames)[:, None] * hop_size + jnp.arange(fft_size)[None, :]
    frames = xp[:, idx]                                   # (B, n_frames, fft)
    nf = min(n_frames, f_int.shape[1])
    frames = frames[:, :nf] * windows_tbl[f_int][:, :nf]  # adaptive windows
    pw = jnp.abs(jnp.fft.rfft(frames, n=fft_size, axis=-1)) ** 2

    # Step 2: smoothing + spectral recovery in the cepstrum domain.
    tmp = jnp.concatenate([pw, jnp.flip(pw[:, :, 1:-1], axis=2)], axis=2)
    cep = jnp.fft.rfft(jnp.log(jnp.maximum(tmp, 1e-7)), axis=-1).real
    lifted = cep * smooth_tbl[f_int][:, :nf] * comp_tbl[f_int][:, :nf]
    if elim_0th:
        lifted = lifted.at[:, :, 0].set(0.0)  # drop 0th cepstrum (power from source net)
    env = jnp.fft.irfft(lifted, n=fft_size, axis=-1)[:, :, :n_bin]  # log power envelope
    if not power:
        env = env / 2.0  # log magnitude envelope
    return env


# ----------------------------------------------------------------------------
# Pallas kernel: target construction + mel projection + log + L1 loss
# ----------------------------------------------------------------------------
def residual_loss_pallas(e, y, s, melmat_padded, n_mels, elim_0th=True,
                         tile_rows=1024):
    """e, y, s: (B, T, F) f32; melmat_padded: (F, Mp) f32 (Mp multiple of 128)."""
    B, T, F = e.shape
    Mp = melmat_padded.shape[1]
    BT = B * T
    total = float(BT * n_mels)  # true element count of F.l1_loss (padding excluded)

    def rup(x, m):
        return ((x + m - 1) // m) * m

    # Cap the row tile so the double-buffered working set stays comfortably
    # inside scoped VMEM on every generation (v5e/v6e/v7x).
    bytes_per_row = 4 * (7 * F + 3 * Mp)   # 3 inputs x 2 bufs + t + proj_t/proj_s/diff
    cap = max(64, (24 * 1024 * 1024) // max(bytes_per_row, 1))
    tile_rows = max(8, min(int(tile_rows), cap))

    if BT <= tile_rows:
        tile_r, n_blocks = BT, 1           # full-dim block: always layout-legal
    else:
        n_blocks = -(-BT // rup(tile_rows, 8))
        if n_blocks % 2:                   # v7x: even block count -> both TCs busy
            n_blocks += 1
        tile_r = rup(-(-BT // n_blocks), 8)
        n_blocks = -(-BT // tile_r)

    need_row_mask = n_blocks * tile_r != BT   # partial boundary block -> mask in-kernel
    pad_sub = (-tile_r) % 8                   # only non-zero for tiny unaligned BT

    # No wrapper-side padding: reshape (B,T,F)->(BT,F) is free (no HBM copy).
    e2 = e.reshape(BT, F)
    y2 = y.reshape(BT, F)
    s2 = s.reshape(BT, F)

    def kernel(e_ref, y_ref, s_ref, mel_ref, out_ref):
        ev = e_ref[...]          # (tile_r, F)
        yv = y_ref[...]          # (tile_r, F)
        sv = s_ref[...]          # (tile_r, F)
        mel = mel_ref[...]       # (F, Mp)

        # --- target construction: t = clamp(y) * exp(-e)  (single EUP exp) ---
        t = jnp.maximum(yv, 1e-7) * jnp.exp(-ev)
        if elim_0th:
            # y_mean / t_mean == sum_y / sum_t (the /F divisors cancel).
            sum_y = jnp.sum(yv, axis=-1, keepdims=True)
            sum_t = jnp.sum(t, axis=-1, keepdims=True)
            t = t * (sum_y * pl.reciprocal(sum_t, approx=True))

        # --- mel projection: two dots against the same resident mel tile ---
        # (bf16 operands with f32 accumulation would cut MXU passes further at a
        #  tiny numerics cost; kept f32 for exact forward semantics.)
        proj_t = jnp.dot(t, mel, preferred_element_type=jnp.float32)
        proj_s = jnp.dot(sv, mel, preferred_element_type=jnp.float32)
        diff = jnp.abs(jnp.log(jnp.maximum(proj_s, 1e-7))
                       - jnp.log(jnp.maximum(proj_t, 1e-7)))   # (tile_r, Mp) lane-dense

        if need_row_mask:
            # Boundary block: rows beyond BT are garbage; every op above is
            # row-local, so garbage stays confined and is zeroed here.
            row0 = pl.program_id(0) * tile_r
            rows = row0 + jax.lax.broadcasted_iota(jnp.int32, (tile_r, 1), 0)
            diff = jnp.where(rows < BT, diff, 0.0)

        if pad_sub:  # tiny unaligned single-block case only (trace-time branch)
            diff = jnp.concatenate(
                [diff, jnp.zeros((pad_sub, Mp), diff.dtype)], axis=0)

        # vreg-shaped partial sum: pure VALU adds across sublane groups; the
        # final lane/sublane reduce happens in JAX on the (n_blocks, 8, Mp) output.
        partial = jnp.sum(diff.reshape(-1, 8, Mp), axis=0)     # (8, Mp)
        out_ref[...] = partial.reshape(1, 8, Mp)

    partials = pl.pallas_call(
        kernel,
        out_shape=jax.ShapeDtypeStruct((n_blocks, 8, Mp), jnp.float32),
        grid_spec=pltpu.PrefetchScalarGridSpec(
            num_scalar_prefetch=0,
            grid=(n_blocks,),
            in_specs=[
                pl.BlockSpec((tile_r, F), lambda i: (i, 0)),
                pl.BlockSpec((tile_r, F), lambda i: (i, 0)),
                pl.BlockSpec((tile_r, F), lambda i: (i, 0)),
                pl.BlockSpec((F, Mp), lambda i: (0, 0)),
            ],
            out_specs=pl.BlockSpec((1, 8, Mp), lambda i: (i, 0, 0)),
        ),
        compiler_params=pltpu.CompilerParams(
            dimension_semantics=("parallel",),   # independent tiles: megacore-shardable
            vmem_limit_bytes=48 * 1024 * 1024,   # headroom for large row tiles
        ),
    )(e2, y2, s2, melmat_padded)

    # Padded mel columns and masked rows contribute exactly 0; divide by the
    # true element count to match F.l1_loss mean semantics.
    return jnp.sum(partials) / total


# ----------------------------------------------------------------------------
# ResidualLoss forward (wrapper)
# ----------------------------------------------------------------------------
class ResidualLossJAX:
    def __init__(self, sampling_rate=2400, fft_size=128, hop_size=60,
                 f0_floor=70, f0_ceil=340, n_mels=16, fmin=0, fmax=None,
                 power=False, elim_0th=True):
        self.sampling_rate = sampling_rate
        self.fft_size = fft_size
        self.hop_size = hop_size
        self.f0_floor = f0_floor
        self.f0_ceil = f0_ceil
        self.power = power
        self.elim_0th = elim_0th
        self.n_mels = n_mels
        self.fmax = fmax if fmax is not None else sampling_rate / 2
        self.window = jnp.asarray(hann_window_periodic(fft_size))

        # (F, M) mel matrix, zero-padded on the mel axis to a multiple of 128 lanes.
        melmat = librosa_mel(sampling_rate, fft_size, n_mels, fmin, self.fmax).T
        F_bins = melmat.shape[0]
        m_pad = ((n_mels + 127) // 128) * 128
        melmat_padded = np.zeros((F_bins, m_pad), dtype=np.float32)
        melmat_padded[:, :n_mels] = melmat
        self.melmat = jnp.asarray(melmat_padded)  # (F, Mp)

        self.ct_tables = tuple(
            jnp.asarray(t)
            for t in make_cheaptrick_tables(sampling_rate, fft_size, f0_floor, f0_ceil)
        )

    def __call__(self, s, y, f):
        # s, y: (B, 1, T); f: (B, 1, T')
        s = jnp.squeeze(s, axis=1).astype(jnp.float32)
        y = jnp.squeeze(y, axis=1).astype(jnp.float32)
        f = jnp.squeeze(f, axis=1).astype(jnp.float32)

        # Spectral analysis (no_grad region in the original) — plain JAX.
        e = cheaptrick(y, f, self.ct_tables, self.sampling_rate, self.fft_size,
                       self.hop_size, self.f0_floor, self.f0_ceil,
                       power=self.power, elim_0th=self.elim_0th)
        y_spec = jax_stft(y, self.fft_size, self.hop_size, self.window, power=self.power)
        s_spec = jax_stft(s, self.fft_size, self.hop_size, self.window, power=self.power)

        minlen = min(e.shape[1], y_spec.shape[1], s_spec.shape[1])
        e, y_spec, s_spec = e[:, :minlen], y_spec[:, :minlen], s_spec[:, :minlen]

        # Hot path in Pallas.
        return residual_loss_pallas(e, y_spec, s_spec, self.melmat, self.n_mels,
                                    elim_0th=self.elim_0th)


if __name__ == "__main__":
    key = jax.random.PRNGKey(0)
    k1, k2, k3 = jax.random.split(key, 3)

    B, T = 2, 480
    hop = 60
    n_frames = T // hop + 1  # 9

    s_sig = 0.1 * jax.random.normal(k1, (B, 1, T), dtype=jnp.float32)
    y_sig = 0.1 * jax.random.normal(k2, (B, 1, T), dtype=jnp.float32)
    f0 = jax.random.uniform(k3, (B, 1, n_frames), minval=80.0, maxval=330.0,
                            dtype=jnp.float32)
    # mark a couple of frames as unvoiced (f0 == 0)
    f0 = f0.at[:, :, 0].set(0.0)

    loss_fn = ResidualLossJAX(sampling_rate=2400, fft_size=128, hop_size=hop,
                              f0_floor=70, f0_ceil=340, n_mels=16, fmin=0,
                              fmax=None, power=False, elim_0th=True)

    loss = loss_fn(s_sig, y_sig, f0)
    loss = jax.block_until_ready(loss)
    assert np.isfinite(float(loss))
    print("KERNEL_OK")
</pallas_src>

<mosaic_0001>
module attributes {stable_mosaic.version = 11 : i64} {
  func.func @kernel(%arg0: i32, %arg1: memref<18x65xf32, #tpu.memory_space<vmem>>, %arg2: memref<18x65xf32, #tpu.memory_space<vmem>>, %arg3: memref<18x65xf32, #tpu.memory_space<vmem>>, %arg4: memref<65x128xf32, #tpu.memory_space<vmem>>, %arg5: memref<1x8x128xf32, #tpu.memory_space<vmem>>) attributes {dimension_semantics = [#tpu.dimension_semantics<parallel>], iteration_bounds = array<i64: 1>, scalar_prefetch = 0 : i64, scratch_operands = 0 : i64, tpu.core_type = #tpu.core_type<tc>, window_params = [{transform_indices = @transform_0, window_bounds = array<i64: 18, 65>}, {transform_indices = @transform_1, window_bounds = array<i64: 18, 65>}, {transform_indices = @transform_2, window_bounds = array<i64: 18, 65>}, {pipeline_mode = #tpu.pipeline_mode<synchronous>, transform_indices = @transform_3, window_bounds = array<i64: 65, 128>}, {transform_indices = @transform_4, window_bounds = array<i64: 1, 8, 128>}]} {
    %c0 = arith.constant 0 : index
    %c0_0 = arith.constant 0 : index
    %0 = vector.load %arg1[%c0, %c0_0] : memref<18x65xf32, #tpu.memory_space<vmem>>, vector<18x65xf32>
    %c0_1 = arith.constant 0 : index
    %c0_2 = arith.constant 0 : index
    %1 = vector.load %arg2[%c0_1, %c0_2] : memref<18x65xf32, #tpu.memory_space<vmem>>, vector<18x65xf32>
    %c0_3 = arith.constant 0 : index
    %c0_4 = arith.constant 0 : index
    %2 = vector.load %arg3[%c0_3, %c0_4] : memref<18x65xf32, #tpu.memory_space<vmem>>, vector<18x65xf32>
    %c0_5 = arith.constant 0 : index
    %c0_6 = arith.constant 0 : index
    %3 = vector.load %arg4[%c0_5, %c0_6] : memref<65x128xf32, #tpu.memory_space<vmem>>, vector<65x128xf32>
    %cst = arith.constant 1.000000e-07 : f32
    %4 = vector.broadcast %cst : f32 to vector<18x65xf32>
    %5 = arith.maximumf %1, %4 : vector<18x65xf32>
    %cst_7 = arith.constant 0.000000e+00 : f32
    %6 = vector.broadcast %cst_7 : f32 to vector<18x65xf32>
    %7 = arith.subf %6, %0 : vector<18x65xf32>
    %8 = math.exp %7 : vector<18x65xf32>
    %9 = arith.mulf %5, %8 : vector<18x65xf32>
    %cst_8 = arith.constant dense<0.000000e+00> : vector<18xf32>
    %10 = vector.multi_reduction <add>, %1, %cst_8 [1] : vector<18x65xf32> to vector<18xf32>
    %11 = vector.shape_cast %10 : vector<18xf32> to vector<18x1xf32>
    %cst_9 = arith.constant dense<0.000000e+00> : vector<18xf32>
    %12 = vector.multi_reduction <add>, %9, %cst_9 [1] : vector<18x65xf32> to vector<18xf32>
    %13 = vector.shape_cast %12 : vector<18xf32> to vector<18x1xf32>
    %14 = tpu.reciprocal %13 {approx = true} : vector<18x1xf32> -> vector<18x1xf32>
    %15 = arith.mulf %11, %14 : vector<18x1xf32>
    %16 = vector.broadcast %15 : vector<18x1xf32> to vector<18x65xf32>
    %17 = arith.mulf %9, %16 : vector<18x65xf32>
    %cst_10 = arith.constant dense<0.000000e+00> : vector<18x128xf32>
    %18 = tpu.matmul %17, %3, %cst_10 {dimension_numbers = #tpu.dot_dimension_numbers<[1], [0], [0], [1], [0, 0, 1, 1], [], []>} : vector<18x65xf32>, vector<65x128xf32>, vector<18x128xf32> -> vector<18x128xf32>
    %cst_11 = arith.constant dense<0.000000e+00> : vector<18x128xf32>
    %19 = tpu.matmul %2, %3, %cst_11 {dimension_numbers = #tpu.dot_dimension_numbers<[1], [0], [0], [1], [0, 0, 1, 1], [], []>} : vector<18x65xf32>, vector<65x128xf32>, vector<18x128xf32> -> vector<18x128xf32>
    %cst_12 = arith.constant 1.000000e-07 : f32
    %20 = vector.broadcast %cst_12 : f32 to vector<18x128xf32>
    %21 = arith.maximumf %19, %20 : vector<18x128xf32>
    %22 = math.log %21 : vector<18x128xf32>
    %cst_13 = arith.constant 1.000000e-07 : f32
    %23 = vector.broadcast %cst_13 : f32 to vector<18x128xf32>
    %24 = arith.maximumf %18, %23 : vector<18x128xf32>
    %25 = math.log %24 : vector<18x128xf32>
    %26 = arith.subf %22, %25 : vector<18x128xf32>
    %27 = math.absf %26 : vector<18x128xf32>
    %cst_14 = arith.constant 0.000000e+00 : f32
    %28 = vector.broadcast %cst_14 : f32 to vector<6x128xf32>
    %29 = tpu.concatenate %27, %28 in 0 : vector<18x128xf32>, vector<6x128xf32> -> vector<24x128xf32>
    %30 = vector.shape_cast %29 : vector<24x128xf32> to vector<3x8x128xf32>
    %cst_15 = arith.constant dense<0.000000e+00> : vector<8x128xf32>
    %31 = vector.multi_reduction <add>, %30, %cst_15 [0] : vector<3x8x128xf32> to vector<8x128xf32>
    %32 = vector.shape_cast %31 : vector<8x128xf32> to vector<1x8x128xf32>
    %c0_16 = arith.constant 0 : index
    %c0_17 = arith.constant 0 : index
    %c0_18 = arith.constant 0 : index
    %33 = vector.load %arg5[%c0_16, %c0_17, %c0_18] : memref<1x8x128xf32, #tpu.memory_space<vmem>>, vector<1x8x128xf32>
    tpu.vector_store %arg5[%c0_16, %c0_17, %c0_18], %32 {strides = array<i32>} : memref<1x8x128xf32, #tpu.memory_space<vmem>>, vector<1x8x128xf32>,
    return
  }
  func.func @transform_0(%arg0: i32) -> (i32, i32) {
    %c0_i32 = arith.constant 0 : i32
    %c0_i32_0 = arith.constant 0 : i32
    return %arg0, %c0_i32 : i32, i32
  }
  func.func @transform_1(%arg0: i32) -> (i32, i32) {
    %c0_i32 = arith.constant 0 : i32
    %c0_i32_0 = arith.constant 0 : i32
    return %arg0, %c0_i32 : i32, i32
  }
  func.func @transform_2(%arg0: i32) -> (i32, i32) {
    %c0_i32 = arith.constant 0 : i32
    %c0_i32_0 = arith.constant 0 : i32
    return %arg0, %c0_i32 : i32, i32
  }
  func.func @transform_3(%arg0: i32) -> (i32, i32) {
    %c0_i32 = arith.constant 0 : i32
    %c0_i32_0 = arith.constant 0 : i32
    %c0_i32_1 = arith.constant 0 : i32
    return %c0_i32, %c0_i32_0 : i32, i32
  }
  func.func @transform_4(%arg0: i32) -> (i32, i32, i32) {
    %c0_i32 = arith.constant 0 : i32
    %c0_i32_0 = arith.constant 0 : i32
    %c0_i32_1 = arith.constant 0 : i32
    return %arg0, %c0_i32, %c0_i32_0 : i32, i32, i32
  }
}

</mosaic_0001>

<bundles_post_ra>
// kernel: tpu_custom_call.1
= control target key start
LH: loop header
LB: loop body
LE: loop exit
PB: predicated region body
PF: predicated region fallthrough
CT: control target
= control target key end

     0   :  { %9 = vsyncpa [#allocation3], 0  ;;  %s782_s0 = inlined_call_operand.hbm [shape: f32[18,65], index: 0, kind: input, shape index: {}]   ;;  %s783_s1 = inlined_call_operand.hbm [shape: f32[18,65], index: 1, kind: input, shape index: {}]   ;;  %s784_s2 = inlined_call_operand.hbm [shape: f32[18,65], index: 2, kind: input, shape index: {}]   ;;  %s785_s3 = inlined_call_operand.hbm [shape: f32[65,128], index: 3, kind: input, shape index: {}]   ;;  %s786_s4 = inlined_call_operand.hbm [shape: f32[1,8,128], index: 4, kind: output, shape index: {}]  }
   0x1   :  { %10 = vsyncpa [#allocation6], 0 }
   0x2   :  { %11 = vsyncpa [#allocation9], 0 }
   0x3   :  { %12 = vsyncpa [#allocation4], 0  ;;  %s625_s15 = smov [#allocation5]   ;;  %s626_s17 = smov [#allocation2]  }
   0x4   :  { %s30_s16 = sshll.u32 %s625_s15, 4  ;;  %s18_s18 = sshll.u32 %s626_s17, 4  ;;  %s31_s16 = int_to_ptr.vmem [resolvable:$true] %s30_s16  ;;  %s660_s18 = int_to_ptr.vmem [resolvable:$true] %s18_s18 }
   0x5   :  { %s507_s21 = scalar_lea.hbm %s783_s1, 384 }
   0x6   :  { %p508_p0 = scmp.ne.s32.totalorder %s783_s1, %s507_s21  ;;  %p511_p1 = scmp.lt.u32.totalorder %s507_s21, %s783_s1 }
   0x8   :  { %p513_p2 = pnand %p511_p1, %p508_p0 }
   0xa   :  { %516 = shalt.err (!%p513_p2)
}
   0xb   :  { %s517_s26 = scalar_lea.vmem %s31_s16, 384  ;;  %p522_p4 = scmp.lt.s32.totalorder %s31_s16, %s31_s16 }
   0xc   :  { %p518_p3 = scmp.ne.s32.totalorder %s31_s16, %s517_s26  ;;  %p523_p5 = scmp.lt.s32.totalorder %s517_s26, %s517_s26 }
   0xe   :  { %p524_p6 = por %p523_p5, %p522_p4 }
  0x10   :  { %p525_p7 = pnand %p524_p6, %p518_p3 }
  0x12   :  { %528 = shalt.err (!%p525_p7)
}
  0x13   :  { %s627_s27 = smov 128   ;;  %s628_s28 = smov 8  }
  0x14   :  { %36 = dma.hbm_to_vmem [thread:$0]  %s783_s1, 384, %s31_s16, [#allocation6], %s627_s27, %s627_s27, %s628_s28  }
  0x15   :  { %s529_s7 = scalar_lea.hbm %s782_s0, 384 }
  0x16   :  { %p530_p8 = scmp.ne.s32.totalorder %s782_s0, %s529_s7  ;;  %p533_p9 = scmp.lt.u32.totalorder %s529_s7, %s782_s0 }
  0x18   :  { %p535_p10 = pnand %p533_p9, %p530_p8 }
  0x1a   :  { %538 = shalt.err (!%p535_p10)
}
  0x1b   :  { %s539_s12 = scalar_lea.vmem %s660_s18, 384  ;;  %p544_p12 = scmp.lt.s32.totalorder %s660_s18, %s660_s18 }
  0x1c   :  { %p540_p11 = scmp.ne.s32.totalorder %s660_s18, %s539_s12  ;;  %p545_p13 = scmp.lt.s32.totalorder %s539_s12, %s539_s12 }
  0x1e   :  { %p546_p0 = por %p545_p13, %p544_p12 }
  0x20   :  { %p547_p1 = pnand %p546_p0, %p540_p11 }
  0x22   :  { %550 = shalt.err (!%p547_p1)
}
  0x23   :  { %24 = dma.hbm_to_vmem [thread:$0]  %s782_s0, 384, %s660_s18, [#allocation3], %s627_s27, %s627_s27, %s628_s28  }
  0x24   :  { %s629_s14 = smov [#allocation7]   ;;  %s630_s16 = smov [#allocation8]  }
  0x25   :  { %s42_s15 = sshll.u32 %s629_s14, 4  ;;  %s54_s17 = sshll.u32 %s630_s16, 4  ;;  %s43_s15 = int_to_ptr.vmem [resolvable:$true] %s42_s15  ;;  %s697_s17 = int_to_ptr.vmem [resolvable:$true] %s54_s17 }
  0x26   :  { %s551_s21 = scalar_lea.hbm %s784_s2, 384 }
  0x27   :  { %p552_p2 = scmp.ne.s32.totalorder %s784_s2, %s551_s21  ;;  %p555_p3 = scmp.lt.u32.totalorder %s551_s21, %s784_s2 }
  0x29   :  { %p557_p4 = pnand %p555_p3, %p552_p2 }
  0x2b   :  { %560 = shalt.err (!%p557_p4)
}
  0x2c   :  { %s561_s0 = scalar_lea.vmem %s43_s15, 384  ;;  %p566_p6 = scmp.lt.s32.totalorder %s43_s15, %s43_s15 }
  0x2d   :  { %p562_p5 = scmp.ne.s32.totalorder %s43_s15, %s561_s0  ;;  %p567_p7 = scmp.lt.s32.totalorder %s561_s0, %s561_s0 }
  0x2f   :  { %p568_p8 = por %p567_p7, %p566_p6 }
  0x31   :  { %p569_p9 = pnand %p568_p8, %p562_p5 }
  0x33   :  { %572 = shalt.err (!%p569_p9)
}
  0x34   :  { %48 = dma.hbm_to_vmem [thread:$0]  %s784_s2, 384, %s43_s15, [#allocation6], %s627_s27, %s627_s27, %s628_s28  }
  0x35   :  { %s573_s5 = scalar_lea.hbm %s785_s3, 1152 }
  0x36   :  { %p574_p10 = scmp.ne.s32.totalorder %s785_s3, %s573_s5  ;;  %p577_p11 = scmp.lt.u32.totalorder %s573_s5, %s785_s3 }
  0x38   :  { %p579_p12 = pnand %p577_p11, %p574_p10 }
  0x3a   :  { %582 = shalt.err (!%p579_p12)
}
  0x3b   :  { %s583_s10 = scalar_lea.vmem %s697_s17, 1152  ;;  %p588_p0 = scmp.lt.s32.totalorder %s697_s17, %s697_s17 }
  0x3c   :  { %p584_p13 = scmp.ne.s32.totalorder %s697_s17, %s583_s10  ;;  %p589_p1 = scmp.lt.s32.totalorder %s583_s10, %s583_s10 }
  0x3e   :  { %p590_p2 = por %p589_p1, %p588_p0 }
  0x40   :  { %p591_p3 = pnand %p590_p2, %p584_p13 }
  0x42   :  { %594 = shalt.err (!%p591_p3)
}
  0x43   :  { %60 = dma.hbm_to_vmem [thread:$0]  %s785_s3, 1152, %s697_s17, [#allocation9], %s627_s27, %s627_s27, %s628_s28  }
  0x44   :  { %617 = dma.done.wait [#allocation3], 384  }
  0x45   :  { %618 = vsyncadd [#allocation3], 4294966912 }
  0x46   :  { %619 = dma.done.wait [#allocation6], 768  }
  0x47   :  { %620 = vsyncadd [#allocation6], 4294966528 }
  0x48   :  { %621 = dma.done.wait [#allocation9], 1152  }
  0x49   :  { %622 = vsyncadd [#allocation9], 4294966144  ;;  %v631_v0 = vmov 0.0|0.0   ;;  %v73_v1 = vld [vmem:[#allocation2] sm:$0xff]  ;;  %v74_v2 = vld [vmem:[#allocation2 + $0x8] sm:$0xff]  ;;  %vm106_vm0 = vcmask 531456  }
  0x4a   :  { %461 = vmatprep.subr.bf16.mxu1 %v631_v0  ;;  %449 = vmatprep.subr.bf16.mxu0 %v631_v0  ;;  %v94_v3 = vsub.f32 0.0, %v73_v1  ;;  %v95_v4 = vsub.f32 0.0, %v74_v2  ;;  %v75_v5 = vld [vmem:[#allocation2 + $0x10] sm:$0x3]  ;;  %v82_v9 = vld [vmem:[#allocation8] sm:$0xff]  ;;  %v76_v13 = vld [vmem:[#allocation5] sm:$0xff] }
  0x4b   :  { %v96_v8 = vsub.f32 0.0, %v75_v5  ;;  %v83_v10 = vld [vmem:[#allocation8 + $0x8] sm:$0xff]  ;;  %v77_v14 = vld [vmem:[#allocation5 + $0x8] sm:$0xff]  ;;  %v91_v15 = vmax.f32 %v76_v13, 1e-07  ;;  %vm113_vm1 = vcmask 525312  }
  0x4c   :  { %v97_v6 = vmul.f32 1.442695, %v94_v3  ;;  %v99_v7 = vmul.f32 1.442695, %v95_v4  ;;  %v450_v11 = vpack.c.bf16 %v83_v10, %v82_v9  ;;  %v78_v16 = vld [vmem:[#allocation5 + $0x10] sm:$0x3] }
  0x4d   :  { %v101_v12 = vmul.f32 1.442695, %v96_v8  ;;  %v92_v17 = vmax.f32 %v77_v14, 1e-07  ;;  %v93_v19 = vmax.f32 %v78_v16, 1e-07 }
  0x4e   :  { %483 = vpow2.f32 %v97_v6  ;;  %463 = vmatpush3.bf16.msra.mxu1 %v450_v11  ;;  %451 = vmatpush3.bf16.msra.mxu0 %v450_v11  ;;  %v107_v28 = vsel %vm106_vm0, %v76_v13, 0.0  ;;  %v110_v29 = vsel %vm106_vm0, %v77_v14, 0.0  ;;  %v114_v30 = vsel %vm113_vm1, %v78_v16, 0.0  ;;  %v84_v31 = vld [vmem:[#allocation8 + $0x10] sm:$0xff]  ;;  %v85_v32 = vld [vmem:[#allocation8 + $0x18] sm:$0xff]  ;;  %v86_v34 = vld [vmem:[#allocation8 + $0x20] sm:$0xff] }
  0x4f   :  { %485 = vpow2.f32 %v99_v7  ;;  %464 = vmatprep.subr.bf16.mxu1 %v631_v0  ;;  %452 = vmatprep.subr.bf16.mxu0 %v631_v0  ;;  %v453_v33 = vpack.c.bf16 %v85_v32, %v84_v31  ;;  %v87_v35 = vld [vmem:[#allocation8 + $0x28] sm:$0xff]  ;;  %v88_v37 = vld [vmem:[#allocation8 + $0x30] sm:$0xff]  ;;  %v89_v38 = vld [vmem:[#allocation8 + $0x38] sm:$0xff]  ;;  %v632_v40 = vmov 0.0   ;;  %vm144_vm2 = vcmask 1040384   ;;  %s634_s3 = smov [#allocation10]  }
  0x50   :  { %487 = vpow2.f32 %v101_v12  ;;  %v456_v36 = vpack.c.bf16 %v87_v35, %v86_v34  ;;  %v459_v39 = vpack.c.bf16 %v89_v38, %v88_v37  ;;  %v90_v41 = vld [vmem:[#allocation8 + $0x40] sm:$0x1]  ;;  %vm633_vm3 = vmmov 0   ;;  %v79_v42 = vld [vmem:[#allocation7] sm:$0xff]  ;;  %v80_v43 = vld [vmem:[#allocation7 + $0x8] sm:$0xff]  ;;  %s352_s27 = sshll.u32 %s634_s3, 4  ;;  %s353_s27 = int_to_ptr.vmem [resolvable:$true] %s352_s27 }
  0x51   :  { %440 = vmatprep.mubr.msk.f32.mxu1 %vm633_vm3, %v632_v40  ;;  %413 = vmatprep.mubr.msk.f32.mxu0 %vm633_vm3, %v632_v40  ;;  %v81_v44 = vld [vmem:[#allocation7 + $0x10] sm:$0x3]  ;;  %vm341_vm4 = vcmask 1041408   ;;  %s595_s28 = scalar_lea.vmem %s353_s27, 128  ;;  %p600_p5 = scmp.lt.s32.totalorder %s353_s27, %s353_s27 }
  0x52   :  { %466 = vmatpush3.bf16.msra.mxu1 %v453_v33  ;;  %454 = vmatpush3.bf16.msra.mxu0 %v453_v33  ;;  %p596_p4 = scmp.ne.s32.totalorder %s353_s27, %s595_s28  ;;  %p601_p6 = scmp.lt.s32.totalorder %s595_s28, %s595_s28 }
  0x53   :  { %467 = vmatprep.subr.bf16.mxu1 %v631_v0  ;;  %455 = vmatprep.subr.bf16.mxu0 %v631_v0 }
  0x54   :  { %p602_p7 = por %p601_p6, %p600_p5 }
  0x56   :  { %469 = vmatpush3.bf16.msra.mxu1 %v456_v36  ;;  %457 = vmatpush3.bf16.msra.mxu0 %v456_v36  ;;  %p603_p8 = pnand %p602_p7, %p596_p4 }
  0x57   :  { %470 = vmatprep.subr.bf16.mxu1 %v631_v0  ;;  %458 = vmatprep.subr.bf16.mxu0 %v631_v0 }
  0x58   :  { %v484_v18 = vpop.eup %483 }
  0x59   :  { %v486_v20 = vpop.eup %485  ;;  %v738_v21 = vmul.f32 %v484_v18, %v91_v15 }
  0x5a   :  { %v740_v22 = vmul.f32 %v486_v20, %v92_v17  ;;  %v488_v23 = vpop.eup %487  ;;  %472 = vmatpush3.bf16.msra.mxu1 %v459_v39  ;;  %460 = vmatpush3.bf16.msra.mxu0 %v459_v39 }
  0x5b   :  { %v117_v24 = vsel %vm106_vm0, %v738_v21, 0.0  ;;  %v744_v25 = vmul.f32 %v488_v23, %v93_v19  ;;  %438 = vmatprep.subr.mxu1 %v632_v40  ;;  %411 = vmatprep.subr.mxu0 %v632_v40 }
  0x5c   :  { %118 = vadd.xlane.f32.xlu0 %v117_v24  ;;  %v120_v26 = vsel %vm106_vm0, %v740_v22, 0.0 }
  0x5d   :  { %v123_v27 = vsel %vm113_vm1, %v744_v25, 0.0 }
  0x5e   :  { %124 = vadd.xlane.f32.xlu1 %v123_v27  ;;  %439 = vmatpush3.msk.msra.mxu1 %vm144_vm2, %v90_v41 }
  0x5f   :  { %412 = vmatpush3.msk.msra.mxu0 %vm144_vm2, %v90_v41  ;;  %441 = vmatmul.mubr.msk.f32.vlgmr.msra.gmra.mrb[0].mxu1 %vm106_vm0, %v79_v42 }
  0x60   :  { %121 = vadd.xlane.f32.xlu0 %v120_v26  ;;  %443 = vmatprep.mubr.msk.f32.mxu1 %vm633_vm3, %v632_v40 }
  0x62   :  { %108 = vadd.xlane.f32.xlu1 %v107_v28 }
  0x63   :  { %444 = vmatmul.mubr.msk.f32.gmra.mrb[2].mxu1 %vm106_vm0, %v80_v43 }
  0x64   :  { %111 = vadd.xlane.f32.xlu0 %v110_v29  ;;  %446 = vmatprep.mubr.msk.f32.mxu1 %vm633_vm3, %v632_v40 }
  0x66   :  { %115 = vadd.xlane.f32.xlu1 %v114_v30 }
  0x67   :  { %447 = vmatmul.mubr.msk.f32.gmra.mrb[4].mxu1 %vm106_vm0, %v81_v44 }
  0xe9   :  { %v119_v45 = vpop.xlane.xlu0 %118 }
  0xea   :  { %489 = vrcp.f32 %v119_v45 }
  0xeb   :  { %v125_v46 = vpop.xlane.xlu1 %124 }
  0xec   :  { %491 = vrcp.f32 %v125_v46 }
  0xed   :  { %v122_v47 = vpop.xlane.xlu0 %121 }
  0xee   :  { %493 = vrcp.f32 %v122_v47 }
  0xef   :  { %v109_v48 = vpop.xlane.xlu1 %108 }
  0xf1   :  { %v112_v51 = vpop.xlane.xlu0 %111 }
  0xf3   :  { %v116_v52 = vpop.xlane.xlu1 %115 }
  0xf4   :  { %v490_v49 = vpop.eup %489 }
  0xf5   :  { %v129_v50 = vmul.f32 %v490_v49, %v109_v48 }
  0xf6   :  { %v492_v53 = vpop.eup %491 }
  0xf7   :  { %v132_v54 = vmul.f32 %v129_v50, %v738_v21  ;;  %v131_v57 = vmul.f32 %v492_v53, %v116_v52 }
  0xf8   :  { %v494_v55 = vpop.eup %493 }
  0xf9   :  { %v130_v56 = vmul.f32 %v494_v55, %v112_v51  ;;  %414 = vmatmul.mubr.msk.f32.vlgmr.msra.gmra.mrb[0].mxu0 %vm106_vm0, %v132_v54  ;;  %v134_v59 = vmul.f32 %v131_v57, %v744_v25 }
  0xfa   :  { %416 = vmatprep.mubr.msk.f32.mxu0 %vm633_vm3, %v632_v40 }
  0xfb   :  { %v133_v58 = vmul.f32 %v130_v56, %v740_v22 }
  0xfd   :  { %417 = vmatmul.mubr.msk.f32.gmra.mrb[2].mxu0 %vm106_vm0, %v133_v58 }
  0xfe   :  { %419 = vmatprep.mubr.msk.f32.mxu0 %vm633_vm3, %v632_v40 }
 0x101   :  { %420 = vmatmul.mubr.msk.f32.gmra.mrb[4].mxu0 %vm106_vm0, %v134_v59 }
 0x132   :  { %v303_v60 = vpop.f32.mrb[0].mxu1 }
 0x133   :  { %v442_v61 = vpop.f32.mrb[1].mxu1  ;;  %v317_v2 = vmax.f32 %v303_v60, 1e-07 }
 0x135   :  { %495 = vlog2.f32 %v317_v2 }
 0x136   :  { %v308_v62 = vpop.f32.mrb[2].mxu1 }
 0x137   :  { %v445_v63 = vpop.f32.mrb[3].mxu1  ;;  %v318_v3 = vmax.f32 %v308_v62, 1e-07 }
 0x139   :  { %497 = vlog2.f32 %v318_v3 }
 0x13a   :  { %v313_v0 = vpop.f32.mrb[4].mxu1 }
 0x13b   :  { %v448_v1 = vpop.f32.mrb[5].mxu1  ;;  %v319_v7 = vmax.f32 %v313_v0, 1e-07 }
 0x13f   :  { %v496_v12 = vpop.eup %495 }
 0x140   :  { %v321_v16 = vmul.f32 0.6931472, %v496_v12 }
 0x143   :  { %v498_v15 = vpop.eup %497 }
 0x144   :  { %v323_v21 = vmul.f32 0.6931472, %v498_v15 }
 0x1cc   :  { %v214_v4 = vpop.f32.mrb[0].mxu0 }
 0x1cd   :  { %v326_v5 = vmax.f32 %v214_v4, 1e-07  ;;  %v415_v6 = vpop.f32.mrb[1].mxu0 }
 0x1cf   :  { %499 = vlog2.f32 %v326_v5 }
 0x1d0   :  { %v219_v8 = vpop.f32.mrb[2].mxu0  ;;  %501 = vlog2.f32 %v319_v7 }
 0x1d1   :  { %v327_v9 = vmax.f32 %v219_v8, 1e-07  ;;  %v418_v10 = vpop.f32.mrb[3].mxu0 }
 0x1d3   :  { %503 = vlog2.f32 %v327_v9 }
 0x1d4   :  { %v224_v11 = vpop.f32.mrb[4].mxu0 }
 0x1d5   :  { %v328_v13 = vmax.f32 %v224_v11, 1e-07  ;;  %v421_v14 = vpop.f32.mrb[5].mxu0 }
 0x1d7   :  { %505 = vlog2.f32 %v328_v13 }
 0x1d9   :  { %v500_v17 = vpop.eup %499 }
 0x1da   :  { %v330_v18 = vmul.f32 0.6931472, %v500_v17  ;;  %v502_v19 = vpop.eup %501 }
 0x1db   :  { %v325_v25 = vmul.f32 0.6931472, %v502_v19 }
 0x1dc   :  { %v335_v20 = vsub.f32 %v321_v16, %v330_v18 }
 0x1dd   :  { %v504_v22 = vpop.eup %503 }
 0x1de   :  { %v332_v23 = vmul.f32 0.6931472, %v504_v22  ;;  %v338_v27 = vand.u32 2147483647, %v335_v20 }
 0x1e0   :  { %v336_v24 = vsub.f32 %v323_v21, %v332_v23 }
 0x1e1   :  { %v506_v26 = vpop.eup %505 }
 0x1e2   :  { %v339_v28 = vand.u32 2147483647, %v336_v24  ;;  %v334_v29 = vmul.f32 0.6931472, %v506_v26 }
 0x1e4   :  { %v337_v30 = vsub.f32 %v325_v25, %v334_v29  ;;  %v343_v31 = vadd.f32 %v339_v28, %v338_v27 }
 0x1e6   :  { %v340_v32 = vand.u32 2147483647, %v337_v30 }
 0x1e8   :  { %v342_v33 = vsel %vm341_vm4, %v340_v32, 0.0 }
 0x1e9   :  { %v344_v34 = vadd.f32 %v343_v31, %v342_v33 }
 0x1eb   :  { %345 = vst [vmem:[#allocation10] sm:$0xff] %v344_v34 }
 0x1ec   :  { %606 = shalt.err (!%p603_p8)
}
 0x1ed   :  { %s607_s13 = scalar_lea.hbm %s786_s4, 128 }
 0x1ee   :  { %p608_p9 = scmp.ne.s32.totalorder %s786_s4, %s607_s13  ;;  %p611_p10 = scmp.lt.u32.totalorder %s607_s13, %s786_s4 }
 0x1f0   :  { %p613_p11 = pnand %p611_p10, %p608_p9 }
 0x1f2   :  { %616 = shalt.err (!%p613_p11)
}
 0x1f3   :  { %355 = dma.vmem_to_hbm [thread:$0]  %s353_s27, 128, %s786_s4, [#allocation4]  }
 0x1f4   :  { %623 = dma.done.wait [#allocation4], 128  }
 0x1f5   :  { %624 = vsyncadd [#allocation4], 4294967168 }
 0x1f6   :  { %359 = vsyncpa [#allocation3], 1 }
 0x1f7   :  { %360 = vsyncpa [#allocation6], 1 }
 0x1f8   :  { %361 = vsyncpa [#allocation9], 1 }
 0x1f9   :  { %362 = vsyncpa [#allocation4], 1 }

</bundles_post_ra>
